<compile_context>
chip_gen: v7x
topology: tpu7x:2x2x1
jax: 0.10.0
libtpu: 0.0.40
codegen_flags: <defaults>
</compile_context>

<pallas_src>
import functools

import jax
import jax.numpy as jnp
from jax.experimental import pallas as pl
from jax.experimental.pallas import tpu as pltpu


# BT.601-ish coefficients used by nunif.
_Y_R, _Y_G, _Y_B = 0.299, 0.587, 0.114
_CB_S, _CR_S = 0.564, 0.713

_MIB = 1024 * 1024

# Max / min bytes of one (input + output) block per grid step.  Double-buffered
# this stays far inside every chip's VMEM (v7x: 64 MiB/TC) while sitting at or
# above the measured HBM-roofline saturation point (~0.5-2 MiB blocks).
_PER_STEP_BUDGET_BYTES = 6 * _MIB
_PER_STEP_FLOOR_BYTES = 1 * _MIB


def _rgb_to_ycbcr_kernel(x_ref, o_ref, *, yycbcr: bool):
    # x_ref: (1, 3, TH, WV), o_ref: (1, c_out, TH, WV)
    r = x_ref[0, 0]
    g = x_ref[0, 1]
    b = x_ref[0, 2]

    # Unscaled luma (needed for cb/cr), then fold the final (*2 - 1) affine:
    #   y_out  = 2*y - 1
    #   cb_out = ((b - y)*0.564 + 0.5)*2 - 1 = (b - y) * 1.128
    #   cr_out = ((r - y)*0.713 + 0.5)*2 - 1 = (r - y) * 1.426
    y = r * _Y_R + g * _Y_G + b * _Y_B
    y_out = (y + y - 1.0).astype(o_ref.dtype)          # cast once, reuse below
    cb_out = ((b - y) * (2.0 * _CB_S)).astype(o_ref.dtype)
    cr_out = ((r - y) * (2.0 * _CR_S)).astype(o_ref.dtype)

    o_ref[0, 0] = y_out
    if yycbcr:
        o_ref[0, 1] = y_out
        o_ref[0, 2] = cb_out
        o_ref[0, 3] = cr_out
    else:
        o_ref[0, 1] = cb_out
        o_ref[0, 2] = cr_out


def _sublane_multiple(dtype) -> int:
    """Native sublane tile for the dtype: 8 (32-bit), 16 (16-bit), 32 (8-bit)."""
    bits = jnp.dtype(dtype).itemsize * 8
    if bits >= 32:
        return 8
    if bits == 16:
        return 16
    return 32


def _pick_tile_rows(hv, wv, c_out, itemsize, sub, tile_rows=None):
    """Rows per block, balancing VMEM budget, pipeline depth and step count."""
    row_bytes = (3 + c_out) * wv * itemsize
    budget_rows = max(1, _PER_STEP_BUDGET_BYTES // row_bytes)
    if tile_rows is not None:
        # User override: still clamp to the VMEM budget (never request more
        # than physical VMEM can double-buffer).
        want = int(tile_rows)
    else:
        # Aim for >= 8 row steps per image, but never shrink a step below
        # ~1 MiB unless that is needed to keep at least 2 steps per image
        # (2 steps lets v7x's two TensorCores split a single frame).
        floor_rows = max(1, _PER_STEP_FLOOR_BYTES // row_bytes)
        want = max(pl.cdiv(hv, 8), min(floor_rows, pl.cdiv(hv, 2)))
    th = min(want, budget_rows, hv)
    if th >= hv:
        return hv  # full extent is always a legal block shape
    # Round to the dtype's sublane multiple: unmasked, vreg-dense vld/vst.
    th = max(sub, (th // sub) * sub)
    return min(th, hv)


def _vmem_limit_bytes(per_step_bytes: int) -> int:
    # 2x double-buffering of the (input + output) block, plus headroom for
    # full-tile elementwise temporaries and Mosaic internal scratch; clamped
    # to 85% of physical VMEM (v7x: 64 MiB/TC, v5e/v6e: 128 MiB).
    want = 4 * per_step_bytes + 4 * _MIB
    cap = 64 * _MIB
    try:
        cap = int(pltpu.get_tpu_info().vmem_capacity_bytes)
    except Exception:
        pass
    return min(max(want, 16 * _MIB), int(0.85 * cap))


def rgb_to_ycbcr(x: jax.Array, yycbcr: bool = False, *, tile_rows=None) -> jax.Array:
    """x: (N, 3, H, W) float array. Returns (N, 3 or 4, H, W)."""
    N, C, H, W = x.shape
    assert C == 3, "expected RGB input with 3 channels"
    c_out = 4 if yycbcr else 3
    itemsize = jnp.dtype(x.dtype).itemsize
    sub = _sublane_multiple(x.dtype)

    # Lane-dense spatial layout: flatten H*W and pick the widest lane width
    # from {512, 256, 128} that divides it.  If none divides, pad the flat
    # spatial dim up to a 128 multiple so stores are never masked.
    s = H * W
    wv = next((cand for cand in (512, 256, 128) if s % cand == 0), None)
    if wv is None:
        wv = 128
        s_pad = pl.cdiv(s, wv) * wv
    else:
        s_pad = s
    hv = s_pad // wv

    xv = x.reshape(N, 3, s)
    if s_pad != s:
        # TODO(synk): wrapper-side pad is an extra HBM copy; a bulk+tail split
        # would avoid it, but the pad is at most 127 elements per plane.
        xv = jnp.pad(xv, ((0, 0), (0, 0), (0, s_pad - s)))
    xv = xv.reshape(N, 3, hv, wv)

    th = _pick_tile_rows(hv, wv, c_out, itemsize, sub, tile_rows)
    per_step_bytes = (3 + c_out) * th * wv * itemsize

    kernel = functools.partial(_rgb_to_ycbcr_kernel, yycbcr=yycbcr)

    out = pl.pallas_call(
        kernel,
        out_shape=jax.ShapeDtypeStruct((N, c_out, hv, wv), x.dtype),
        grid_spec=pltpu.PrefetchScalarGridSpec(
            num_scalar_prefetch=0,
            grid=(N, pl.cdiv(hv, th)),
            in_specs=[pl.BlockSpec((1, 3, th, wv), lambda n, h: (n, 0, h, 0))],
            out_specs=pl.BlockSpec((1, c_out, th, wv), lambda n, h: (n, 0, h, 0)),
        ),
        compiler_params=pltpu.CompilerParams(
            dimension_semantics=("parallel", "parallel"),
            vmem_limit_bytes=_vmem_limit_bytes(per_step_bytes),
        ),
        cost_estimate=pl.CostEstimate(
            flops=11 * N * s,
            transcendentals=0,
            bytes_accessed=(3 + c_out) * N * s * itemsize,
        ),
    )(xv)

    out = out.reshape(N, c_out, s_pad)
    if s_pad != s:
        out = out[:, :, :s]
    return out.reshape(N, c_out, H, W)


class RGBToYCbCr:
    """JAX/Pallas equivalent of nunif's RGBToYCbCr module (no parameters)."""

    def __init__(self, yycbcr: bool = False):
        self.yycbcr = yycbcr

    def __call__(self, x):
        return rgb_to_ycbcr(x, self.yycbcr)


def _reference(x, yycbcr=False):
    r = x[:, 0:1, :, :]
    g = x[:, 1:2, :, :]
    b = x[:, 2:3, :, :]
    y = r * 0.299 + g * 0.587 + b * 0.114
    cb = (b - y) * 0.564 + 0.5
    cr = (r - y) * 0.713 + 0.5
    parts = [y, y, cb, cr] if yycbcr else [y, cb, cr]
    return jnp.concatenate(parts, axis=1) * 2.0 - 1.0


if __name__ == "__main__":
    key = jax.random.PRNGKey(0)
    k1, k2, k3, k4 = jax.random.split(key, 4)

    # Small NCHW input, both modes (W=16 exercises the lane-dense flatten path).
    x = jax.random.uniform(k1, (2, 3, 16, 16), dtype=jnp.float32)
    for yy in (False, True):
        out = jax.block_until_ready(rgb_to_ycbcr(x, yycbcr=yy))
        ref = _reference(x, yycbcr=yy)
        assert out.shape == ref.shape
        assert jnp.allclose(out, ref, atol=1e-5), f"mismatch vs reference (yycbcr={yy})"

    # Forced spatial row tiling (multi-block grid, even split).
    x2 = jax.random.uniform(k2, (2, 3, 16, 128), dtype=jnp.float32)
    out2 = jax.block_until_ready(rgb_to_ycbcr(x2, tile_rows=8))
    assert jnp.allclose(out2, _reference(x2), atol=1e-5), "mismatch (tiled)"

    # Ragged row tiling (hv not divisible by the tile height).
    x3 = jax.random.uniform(k3, (1, 3, 20, 128), dtype=jnp.float32)
    out3 = jax.block_until_ready(rgb_to_ycbcr(x3, yycbcr=True, tile_rows=8))
    assert jnp.allclose(out3, _reference(x3, yycbcr=True), atol=1e-5), "mismatch (ragged)"

    # Awkward spatial size: H*W not a multiple of 128 -> padded lane-dense path.
    x4 = jax.random.uniform(k4, (1, 3, 13, 17), dtype=jnp.float32)
    out4 = jax.block_until_ready(rgb_to_ycbcr(x4))
    assert jnp.allclose(out4, _reference(x4), atol=1e-5), "mismatch (padded)"

    print("KERNEL_OK")
</pallas_src>

<mosaic_0001>
module attributes {stable_mosaic.version = 11 : i64} {
  func.func @_rgb_to_ycbcr_kernel(%arg0: i32, %arg1: i32, %arg2: memref<1x3x1x256xf32, #tpu.memory_space<vmem>>, %arg3: memref<1x3x1x256xf32, #tpu.memory_space<vmem>>) attributes {dimension_semantics = [#tpu.dimension_semantics<parallel>, #tpu.dimension_semantics<parallel>], iteration_bounds = array<i64: 2, 1>, scalar_prefetch = 0 : i64, scratch_operands = 0 : i64, tpu.core_type = #tpu.core_type<tc>, window_params = [{transform_indices = @transform_0, window_bounds = array<i64: 1, 3, 1, 256>}, {transform_indices = @transform_1, window_bounds = array<i64: 1, 3, 1, 256>}]} {
    %c0 = arith.constant 0 : index
    %c0_0 = arith.constant 0 : index
    %c0_1 = arith.constant 0 : index
    %c0_2 = arith.constant 0 : index
    %0 = vector.load %arg2[%c0, %c0_0, %c0_1, %c0_2] : memref<1x3x1x256xf32, #tpu.memory_space<vmem>>, vector<1x1x1x256xf32>
    %1 = vector.shape_cast %0 : vector<1x1x1x256xf32> to vector<1x256xf32>
    %c0_3 = arith.constant 0 : index
    %c1 = arith.constant 1 : index
    %c0_4 = arith.constant 0 : index
    %c0_5 = arith.constant 0 : index
    %2 = vector.load %arg2[%c0_3, %c1, %c0_4, %c0_5] : memref<1x3x1x256xf32, #tpu.memory_space<vmem>>, vector<1x1x1x256xf32>
    %3 = vector.shape_cast %2 : vector<1x1x1x256xf32> to vector<1x256xf32>
    %c0_6 = arith.constant 0 : index
    %c2 = arith.constant 2 : index
    %c0_7 = arith.constant 0 : index
    %c0_8 = arith.constant 0 : index
    %4 = vector.load %arg2[%c0_6, %c2, %c0_7, %c0_8] : memref<1x3x1x256xf32, #tpu.memory_space<vmem>>, vector<1x1x1x256xf32>
    %5 = vector.shape_cast %4 : vector<1x1x1x256xf32> to vector<1x256xf32>
    %cst = arith.constant 2.990000e-01 : f32
    %6 = vector.broadcast %cst : f32 to vector<1x256xf32>
    %7 = arith.mulf %1, %6 : vector<1x256xf32>
    %cst_9 = arith.constant 5.870000e-01 : f32
    %8 = vector.broadcast %cst_9 : f32 to vector<1x256xf32>
    %9 = arith.mulf %3, %8 : vector<1x256xf32>
    %10 = arith.addf %7, %9 : vector<1x256xf32>
    %cst_10 = arith.constant 1.140000e-01 : f32
    %11 = vector.broadcast %cst_10 : f32 to vector<1x256xf32>
    %12 = arith.mulf %5, %11 : vector<1x256xf32>
    %13 = arith.addf %10, %12 : vector<1x256xf32>
    %14 = arith.addf %13, %13 : vector<1x256xf32>
    %cst_11 = arith.constant 1.000000e+00 : f32
    %15 = vector.broadcast %cst_11 : f32 to vector<1x256xf32>
    %16 = arith.subf %14, %15 : vector<1x256xf32>
    %17 = arith.subf %5, %13 : vector<1x256xf32>
    %cst_12 = arith.constant 1.128000e+00 : f32
    %18 = vector.broadcast %cst_12 : f32 to vector<1x256xf32>
    %19 = arith.mulf %17, %18 : vector<1x256xf32>
    %20 = arith.subf %1, %13 : vector<1x256xf32>
    %cst_13 = arith.constant 1.426000e+00 : f32
    %21 = vector.broadcast %cst_13 : f32 to vector<1x256xf32>
    %22 = arith.mulf %20, %21 : vector<1x256xf32>
    %c0_14 = arith.constant 0 : index
    %c0_15 = arith.constant 0 : index
    %c0_16 = arith.constant 0 : index
    %c0_17 = arith.constant 0 : index
    %23 = vector.load %arg3[%c0_14, %c0_15, %c0_16, %c0_17] : memref<1x3x1x256xf32, #tpu.memory_space<vmem>>, vector<1x1x1x256xf32>
    %24 = vector.shape_cast %23 : vector<1x1x1x256xf32> to vector<1x256xf32>
    %25 = vector.shape_cast %16 : vector<1x256xf32> to vector<1x1x1x256xf32>
    tpu.vector_store %arg3[%c0_14, %c0_15, %c0_16, %c0_17], %25 {strides = array<i32>} : memref<1x3x1x256xf32, #tpu.memory_space<vmem>>, vector<1x1x1x256xf32>,
    %c0_18 = arith.constant 0 : index
    %c1_19 = arith.constant 1 : index
    %c0_20 = arith.constant 0 : index
    %c0_21 = arith.constant 0 : index
    %26 = vector.load %arg3[%c0_18, %c1_19, %c0_20, %c0_21] : memref<1x3x1x256xf32, #tpu.memory_space<vmem>>, vector<1x1x1x256xf32>
    %27 = vector.shape_cast %26 : vector<1x1x1x256xf32> to vector<1x256xf32>
    %28 = vector.shape_cast %19 : vector<1x256xf32> to vector<1x1x1x256xf32>
    tpu.vector_store %arg3[%c0_18, %c1_19, %c0_20, %c0_21], %28 {strides = array<i32>} : memref<1x3x1x256xf32, #tpu.memory_space<vmem>>, vector<1x1x1x256xf32>,
    %c0_22 = arith.constant 0 : index
    %c2_23 = arith.constant 2 : index
    %c0_24 = arith.constant 0 : index
    %c0_25 = arith.constant 0 : index
    %29 = vector.load %arg3[%c0_22, %c2_23, %c0_24, %c0_25] : memref<1x3x1x256xf32, #tpu.memory_space<vmem>>, vector<1x1x1x256xf32>
    %30 = vector.shape_cast %29 : vector<1x1x1x256xf32> to vector<1x256xf32>
    %31 = vector.shape_cast %22 : vector<1x256xf32> to vector<1x1x1x256xf32>
    tpu.vector_store %arg3[%c0_22, %c2_23, %c0_24, %c0_25], %31 {strides = array<i32>} : memref<1x3x1x256xf32, #tpu.memory_space<vmem>>, vector<1x1x1x256xf32>,
    return
  }
  func.func @transform_0(%arg0: i32, %arg1: i32) -> (i32, i32, i32, i32) {
    %c0_i32 = arith.constant 0 : i32
    %c0_i32_0 = arith.constant 0 : i32
    %c0_i32_1 = arith.constant 0 : i32
    return %arg0, %c0_i32, %arg1, %c0_i32_0 : i32, i32, i32, i32
  }
  func.func @transform_1(%arg0: i32, %arg1: i32) -> (i32, i32, i32, i32) {
    %c0_i32 = arith.constant 0 : i32
    %c0_i32_0 = arith.constant 0 : i32
    %c0_i32_1 = arith.constant 0 : i32
    return %arg0, %c0_i32, %arg1, %c0_i32_0 : i32, i32, i32, i32
  }
}

</mosaic_0001>

<bundles_post_ra>
// kernel: tpu_custom_call.1
= control target key start
LH: loop header
LB: loop body
LE: loop exit
PB: predicated region body
PF: predicated region fallthrough
CT: control target
= control target key end

     0   :  { %6 = vsyncpa [#allocation3], 0  ;;  %s670_s0 = inlined_call_operand.hbm [shape: f32[2,3,1,256], index: 0, kind: input, shape index: {}]   ;;  %s671_s1 = inlined_call_operand.hbm [shape: f32[2,3,1,256], index: 1, kind: output, shape index: {}]  }
   0x1   :  { %8 = vsyncpa [#allocation3 + $0x1], 0 }
   0x2   :  { %9 = vsyncpa [#allocation4], 0 }
   0x3   :  { %11 = vsyncpa [#allocation4 + $0x1], 0  ;;  %s495_s6 = smov 0   ;;  %s497_s7 = smov 0  }
   0x4   :  { %s499_s8 = smov 0   ;;  %s501_s9 = smov 0  }
   0x5   :  { %s503_s10 = smov 0   ;;  %s505_s11 = smov 0  }
   0x6 LB: > { %s281_s12 = sadd.s32 4294967295, %s477_s11   ;;  %s282_s13 = sadd.s32 4294967294, %s477_s11   ;;  %s477_s11 = sphi %s505_s11, %s17_s11   ;;  %s473_s10 = sphi %s503_s10, %s686_s10   ;;  %s469_s9 = sphi %s501_s9, %s685_s9   ;;  %s465_s8 = sphi %s499_s8, %s684_s8   ;;  %s461_s7 = sphi %s497_s7, %s683_s7   ;;  %s457_s6 = sphi %s495_s6, %s682_s6  }
   0x7   : > { %s29_s14 = sadd.s32 1, %s473_s10  ;;  %s38_s15 = sadd.s32 1, %s465_s8 }
   0x8   : > { %p31_p0 = scmp.ge.s32.totalorder %s29_s14, 2  ;;  %p45_p1 = scmp.ne.s32.totalorder %s465_s8, %s461_s7 }
   0x9   : > { %p46_p2 = scmp.eq.s32.totalorder %s477_s11, 0  ;;  %p51_p3 = scmp.ne.s32.totalorder %s461_s7, %s457_s6 }
   0xa   : > { %s688_s14 = smov (%p31_p0, %s29_s14), 0  ;;  %p52_p5 = scmp.eq.s32.totalorder %s281_s12, 0 }
   0xb   : > { %p536_p4 = por %p46_p2, %p45_p1  ;;  %s33_s17 = ssub.s32 %s473_s10, %s688_s14 }
   0xc   : > { %p77_p6 = scmp.eq.s32.totalorder %s281_s12, 1  ;;  %p36_p7 = scmp.eq.s32.totalorder %s33_s17, 0 }
   0xd   : > { %p542_p8 = por %p52_p5, %p51_p3  ;;  %p83_p10 = scmp.eq.s32.totalorder %s282_s13, 1 }
   0xe   : > { %p546_p9 = por %p77_p6, %p45_p1  ;;  %p311_p13 = scmp.lt.s32.totalorder %s477_s11, 2 }
   0xf   : > { %s551_s20 = scalar_select %p36_p7, %s465_s8, %s38_s15  }
  0x10   : > { %s675_s19 = scalar_select %p546_p9, 1, 0 }
  0x11   : > { %p553_p11 = por %p83_p10, %p51_p3  ;;  %s103_s22 = sand.u32 1, %s465_s8  }
  0x12   : > { %s295_s23 = smul.u32 6, %s103_s22  ;;  %p563_p0 = pnand %p311_p13, %p536_p4 }
  0x13   : > { %s676_s21 = scalar_select %p553_p11, 1, 0 }
  0x14   : > { %s296_s24 = smul.u32 96, %s473_s10  ;;  %s107_s29 = scalar_lea.vmem [#allocation2], %s295_s23 }
  0x15   : > { %s116_s30 = sshll.u32 %s107_s29, 4  ;;  %s575_s2 = scalar_lea.sflag [#allocation3], %s103_s22  ;;  %s572_s30 = int_to_ptr.vmem [resolvable:$true] %s116_s30 }
  0x16   : > { %s570_s28 = scalar_lea.hbm %s670_s0, %s296_s24  ;;  %p367_p3 = pneg %p563_p0 }
  0x17   : > { %s365_s3 = scalar_lea.hbm %s570_s28, 96  ;;  %s370_s12 = scalar_lea.hbm %s670_s0, 192 }
  0x18   : > { %p366_p2 = scmp.ne.s32.totalorder %s570_s28, %s365_s3  ;;  %p371_p6 = scmp.lt.u32.totalorder %s570_s28, %s670_s0 }
  0x19   : > { %p372_p7 = scmp.lt.u32.totalorder %s370_s12, %s365_s3  ;;  %p374_p13 = scmp.lt.u32.totalorder %s365_s3, %s570_s28 }
  0x1a   : > { %p368_p4 = pnand %p367_p3, %p366_p2 }
  0x1b   : > { %p373_p10 = por %p372_p7, %p371_p6 }
  0x1c   : > { %p369_p5 = pneg %p368_p4 }
  0x1d   : > { %p375_p12 = por %p374_p13, %p373_p10 }
  0x1f   : > { %p376_p1 = pnand %p375_p12, %p369_p5 }
  0x21   : > { %379 = shalt.err (!%p376_p1)
}
  0x22   : > { %s380_s16 = scalar_lea.vmem %s572_s30, 96  ;;  %s479_s17 = smov [#allocation2]  }
  0x23   : > { %p381_p2 = scmp.ne.s32.totalorder %s572_s30, %s380_s16  ;;  %s385_s22 = sshll.u32 %s479_s17, 4  ;;  %s386_s22 = int_to_ptr.vmem [resolvable:$false] %s385_s22 }
  0x24   : > { %s387_s23 = scalar_lea.vmem %s386_s22, 192  ;;  %p388_p9 = scmp.lt.s32.totalorder %s572_s30, %s386_s22 }
  0x25   : > { %p383_p4 = pnand %p381_p2, %p367_p3  ;;  %p389_p6 = scmp.lt.s32.totalorder %s387_s23, %s380_s16 }
  0x27   : > { %p384_p11 = pneg %p383_p4  ;;  %p390_p7 = por %p389_p6, %p388_p9 }
  0x29   : > { %p391_p10 = pnand %p390_p7, %p384_p11 }
  0x2b   : > { %394 = shalt.err (!%p391_p10)
}
  0x2c   : > { %s480_s24 = smov 32   ;;  %s481_s26 = smov 2  }
  0x2d   : > { %306 = dma.hbm_to_vmem [thread:$0]  (!%p563_p0), %s570_s28, 96, %s572_s30, %s575_s2, %s480_s24, %s480_s24, %s481_s26  }
  0x2e   : > { %p124_p12 = scmp.lt.s32.totalorder %s477_s11, 3  ;;  %p678_p1 = scmp.ge.s32.totalorder %s477_s11, 1 }
  0x30   : > { %p125_p3 = pnand %p678_p1, %p124_p12 }
  0x31   : > { %s607_s27 = sand.u32 (!%p125_p3), 1, %s461_s7  }
  0x32   : > { %128 = sbr.rel (%p125_p3) target bundleno = 86 (0x56), region = 24  ;;  %s131_s3 = scalar_lea.sflag (!%p125_p3), [#allocation3], %s607_s27 }
  0x33   : > { %s297_s29 = smul.u32 (!%p125_p3), 6, %s607_s27 }
  0x35   : > { %s134_s4 = scalar_lea.vmem (!%p125_p3), [#allocation2], %s297_s29 }
  0x39   : > { %448 = dma.done.wait (%p542_p8), %s131_s3, 96  }
  0x3a   : > { %450 = vsyncadd (%p542_p8), %s131_s3, 4294967200  ;;  %v153_v0 = vld [vmem:[%s134_s4] sm:$0x3]  ;;  %v287_v1 = vld [vmem:[%s134_s4 + $0x2] sm:$0x3]  ;;  %v169_v7 = vlaneseq  ;;  %s152_s25 = scalar_lea.vmem [#allocation5], %s297_s29 }
  0x3b   : > { %v288_v2 = vld [vmem:[%s134_s4 + $0x4] sm:$0x3]  ;;  %v158_v3 = vmul.f32 0.299, %v153_v0  ;;  %v159_v4 = vmul.f32 0.587, %v287_v1 }
  0x3c   : > { %v161_v5 = vmul.f32 0.114, %v288_v2  ;;  %s194_s28 = sshll.u32 %s152_s25, 4  ;;  %s298_s30 = smul.u32 96, %s469_s9  ;;  %vm171_vm0 = vcmp.lt.s32.totalorder %v169_v7, 256  ;;  %s616_s28 = int_to_ptr.vmem [resolvable:$true] %s194_s28 }
  0x3d   : > { %v160_v6 = vadd.f32 %v159_v4, %v158_v3  ;;  %s179_s9 = scalar_lea.sflag [#allocation4], %s607_s27  ;;  %s395_s12 = scalar_lea.vmem %s616_s28, 96 }
  0x3e   : > { %s621_s5 = scalar_lea.hbm %s671_s1, %s298_s30  ;;  %p396_p8 = scmp.ne.s32.totalorder %s616_s28, %s395_s12 }
  0x3f   : > { %v162_v8 = vadd.f32 %v161_v5, %v160_v6  ;;  %p679_p9 = scmp.ne.s32.totalorder %s675_s19, 0  ;;  %s482_s13 = smov [#allocation5]  }
  0x40   : > { %s399_s15 = sshll.u32 %s482_s13, 4  ;;  %s400_s15 = int_to_ptr.vmem [resolvable:$false] %s399_s15 }
  0x41   : > { %v163_v9 = vadd.f32 %v162_v8, %v162_v8  ;;  %v165_v10 = vsub.f32 %v288_v2, %v162_v8  ;;  %v167_v11 = vsub.f32 %v153_v0, %v162_v8  ;;  %p397_p11 = pnand %p396_p8, %p679_p9  ;;  %s401_s16 = scalar_lea.vmem %s400_s15, 192 }
  0x42   : > { %p402_p5 = scmp.lt.s32.totalorder %s616_s28, %s400_s15  ;;  %p403_p13 = scmp.lt.s32.totalorder %s401_s16, %s395_s12 }
  0x43   : > { %v289_v12 = vadd.f32 -1.0, %v163_v9  ;;  %v166_v13 = vmul.f32 1.128, %v165_v10  ;;  %v168_v14 = vmul.f32 1.426, %v167_v11  ;;  %p398_p0 = pneg %p397_p11 }
  0x44   : > { %p404_p2 = por %p403_p13, %p402_p5 }
  0x45   : > { %173 = vst.msk [vmem:[%s152_s25] sm:$0x3] %vm171_vm0, %v289_v12  ;;  %290 = vst.msk [vmem:[%s152_s25 + $0x2] sm:$0x3] %vm171_vm0, %v166_v13 }
  0x46   : > { %291 = vst.msk [vmem:[%s152_s25 + $0x4] sm:$0x3] %vm171_vm0, %v168_v14  ;;  %p405_p4 = pnand %p404_p2, %p398_p0 }
  0x48   : > { %408 = shalt.err (!%p405_p4)
}
  0x49   : > { %s409_s17 = scalar_lea.hbm %s621_s5, 96  ;;  %s413_s24 = scalar_lea.hbm %s671_s1, 192 }
  0x4a   : > { %p410_p6 = scmp.ne.s32.totalorder %s621_s5, %s409_s17  ;;  %p414_p12 = scmp.lt.u32.totalorder %s621_s5, %s671_s1 }
  0x4b   : > { %p415_p1 = scmp.lt.u32.totalorder %s413_s24, %s409_s17  ;;  %p417_p8 = scmp.lt.u32.totalorder %s409_s17, %s621_s5 }
  0x4c   : > { %p411_p7 = pnand %p410_p6, %p679_p9 }
  0x4d   : > { %p416_p3 = por %p415_p1, %p414_p12 }
  0x4e   : > { %p412_p10 = pneg %p411_p7 }
  0x4f   : > { %p418_p11 = por %p417_p8, %p416_p3 }
  0x51   : > { %p419_p0 = pnand %p418_p11, %p412_p10 }
  0x53   : > { %422 = shalt.err (!%p419_p0)
}
  0x54   : > { %s483_s3 = smov 32   ;;  %s484_s4 = smov 2  }
  0x55   : > { %301 = dma.vmem_to_hbm [thread:$0]  (%p679_p9), %s616_s28, 96, %s621_s5, %s179_s9, %s483_s3, %s483_s3, %s484_s4  }
  0x56 PF: > { %s209_s25 = sand.u32 1, %s457_s6   ;;  %p680_p5 = scmp.ne.s32.totalorder %s676_s21, 0 }
  0x57   : > { %p681_p13 = scmp.ge.s32.totalorder %s477_s11, 2  ;;  %s210_s30 = scalar_lea.sflag [#allocation4], %s209_s25 }
  0x59   : > { %p308_p2 = pnand %p681_p13, %p680_p5 }
  0x5b   : > { %452 = dma.done.wait (!%p308_p2), %s210_s30, 96  }
  0x5c   : > { %454 = vsyncadd (!%p308_p2), %s210_s30, 4294967200  ;;  %s17_s11 = sadd.s32 1, %s477_s11   ;;  %s682_s6 = smov %s461_s7 }
  0x5d   : > { %p14_p4 = scmp.ge.s32.totalorder %s17_s11, 4   ;;  %s683_s7 = smov %s465_s8 }
  0x5e   : > { %s684_s8 = smov %s551_s20  ;;  %s685_s9 = smov %s473_s10 }
  0x5f   : > { %s686_s10 = smov %s688_s14  ;;  %16 = sbr.rel (!%p14_p4) target bundleno = 6 (0x6), region = 73 }
  0x66   :  { %215 = vsyncpa [#allocation3], 1 }
  0x67   :  { %217 = vsyncpa [#allocation3 + $0x1], 1 }
  0x68   :  { %218 = vsyncpa [#allocation4], 1 }
  0x69   :  { %220 = vsyncpa [#allocation4 + $0x1], 1 }

</bundles_post_ra>
